<compile_context>
chip_gen: v7x
topology: tpu7x:2x2x1
jax: 0.10.0
libtpu: 0.0.40
codegen_flags: <defaults>
</compile_context>

<pallas_src>
import functools
import math

import jax
import jax.numpy as jnp
from jax.experimental import pallas as pl
from jax.experimental.pallas import tpu as pltpu


# --------------------------------------------------------------------------
# Kernel 1: fused QKV projection  (x[M,H] @ Wqkv[H,3H] + b_qkv) -> [M,3H]
# Full-K single pass: matmul + bias written directly, no scratch.
# --------------------------------------------------------------------------
def _matmul_bias_kernel(x_ref, w_ref, b_ref, o_ref):
    acc = jnp.dot(x_ref[...], w_ref[...], preferred_element_type=jnp.float32)
    acc = acc + b_ref[...].astype(jnp.float32)
    o_ref[...] = acc.astype(o_ref.dtype)


def _matmul_bias(x2d, w_t, b2d, *, tm, tn):
    M, K = x2d.shape
    N = w_t.shape[1]
    tm = min(tm, M)   # if clamped, block == full dim -> always legal
    tn = min(tn, N)
    grid = (pl.cdiv(M, tm), pl.cdiv(N, tn))
    return pl.pallas_call(
        _matmul_bias_kernel,
        out_shape=jax.ShapeDtypeStruct((M, N), x2d.dtype),
        grid_spec=pltpu.PrefetchScalarGridSpec(
            num_scalar_prefetch=0,
            grid=grid,
            in_specs=[
                pl.BlockSpec((tm, K), lambda i, j: (i, 0)),
                pl.BlockSpec((K, tn), lambda i, j: (0, j)),
                pl.BlockSpec((1, tn), lambda i, j: (0, j)),
            ],
            out_specs=pl.BlockSpec((tm, tn), lambda i, j: (i, j)),
        ),
        compiler_params=pltpu.CompilerParams(
            dimension_semantics=("parallel", "parallel"),
        ),
    )(x2d, w_t, b2d)


# --------------------------------------------------------------------------
# Kernel 2: per-(batch, head) attention core.
#   softmax(Q K^T * scale + mask) @ V, all in one VMEM-resident pass.
# --------------------------------------------------------------------------
def _attention_kernel(q_ref, k_ref, v_ref, mask_ref, o_ref, *, scale):
    q = q_ref[0, 0]                    # [S, D]
    k = k_ref[0, 0]                    # [S, D]
    v = v_ref[0, 0]                    # [S, D]
    scores = jnp.dot(q, k.T, preferred_element_type=jnp.float32) * scale
    scores = scores + mask_ref[0].astype(jnp.float32)       # [1,S] bcast rows
    m = jnp.max(scores, axis=-1, keepdims=True)
    p = jnp.exp(scores - m)
    denom = jnp.sum(p, axis=-1, keepdims=True)
    probs = p / denom
    # TODO(synk): attention-prob dropout (p=0.1) skipped -- eval mode identity.
    ctx = jnp.dot(probs.astype(v.dtype), v, preferred_element_type=jnp.float32)
    o_ref[0, 0] = ctx.astype(o_ref.dtype)


# --------------------------------------------------------------------------
# Kernel 3: output dense + bias + residual add + LayerNorm (eps=1e-12), fused.
# Full hidden dim per block (needed for the row-wise LayerNorm reduction).
# --------------------------------------------------------------------------
def _out_dense_layernorm_kernel(x_ref, w_ref, b_ref, res_ref, g_ref, beta_ref,
                                o_ref, *, eps):
    y = jnp.dot(x_ref[...], w_ref[...], preferred_element_type=jnp.float32)
    y = y + b_ref[...].astype(jnp.float32)
    # TODO(synk): hidden dropout (p=0.1) skipped -- eval mode identity.
    y = y + res_ref[...].astype(jnp.float32)
    mean = jnp.mean(y, axis=-1, keepdims=True)
    centered = y - mean
    var = jnp.mean(centered * centered, axis=-1, keepdims=True)
    normed = centered * jax.lax.rsqrt(var + eps)
    out = normed * g_ref[...].astype(jnp.float32) + beta_ref[...].astype(jnp.float32)
    o_ref[...] = out.astype(o_ref.dtype)


# --------------------------------------------------------------------------
# Parameter prep (done once, outside the per-call hot path).
# Torch Linear weights are [out, in]; store them transposed ([in, out]) and
# concatenate Q/K/V so the projection is a single matmul / single weight read.
# --------------------------------------------------------------------------
def prepare_bert_attention_params(params):
    H = params["wq"].shape[1]
    w_qkv_t = jnp.concatenate(
        [params["wq"].T, params["wk"].T, params["wv"].T], axis=1)     # [H, 3H]
    b_qkv = jnp.concatenate(
        [params["bq"], params["bk"], params["bv"]]).reshape(1, 3 * H)  # [1, 3H]
    return {
        "w_qkv_t": w_qkv_t,
        "b_qkv": b_qkv,
        "wo_t": params["wo"].T,                 # [H, H]
        "bo": params["bo"].reshape(1, H),
        "gamma": params["gamma"].reshape(1, H),
        "beta": params["beta"].reshape(1, H),
    }


def bert_attention(prepared, hidden_states, attention_mask, *, num_heads,
                   tm=256, tn=512, eps=1e-12):
    """hidden_states: [B, S, H]; attention_mask: additive, [B, 1, 1, S]."""
    B, S, H = hidden_states.shape
    D = H // num_heads
    M = B * S
    x2d = hidden_states.reshape(M, H)

    # ---- fused Q/K/V projection (one weight pass) ------------------------
    qkv = _matmul_bias(x2d, prepared["w_qkv_t"], prepared["b_qkv"], tm=tm, tn=tn)
    qkv = qkv.reshape(B, S, 3, num_heads, D)
    q = qkv[:, :, 0].transpose(0, 2, 1, 3)        # [B, NH, S, D]
    k = qkv[:, :, 1].transpose(0, 2, 1, 3)
    v = qkv[:, :, 2].transpose(0, 2, 1, 3)

    mask = attention_mask.reshape(B, 1, S)        # additive mask

    # ---- attention core, grid over (batch, head) -------------------------
    scale = 1.0 / math.sqrt(D)
    attn_out = pl.pallas_call(
        functools.partial(_attention_kernel, scale=scale),
        out_shape=jax.ShapeDtypeStruct((B, num_heads, S, D), hidden_states.dtype),
        grid_spec=pltpu.PrefetchScalarGridSpec(
            num_scalar_prefetch=0,
            grid=(B, num_heads),
            in_specs=[
                pl.BlockSpec((1, 1, S, D), lambda b, h: (b, h, 0, 0)),
                pl.BlockSpec((1, 1, S, D), lambda b, h: (b, h, 0, 0)),
                pl.BlockSpec((1, 1, S, D), lambda b, h: (b, h, 0, 0)),
                pl.BlockSpec((1, 1, S), lambda b, h: (b, 0, 0)),
            ],
            out_specs=pl.BlockSpec((1, 1, S, D), lambda b, h: (b, h, 0, 0)),
        ),
        compiler_params=pltpu.CompilerParams(
            dimension_semantics=("parallel", "parallel"),
        ),
    )(q, k, v, mask)

    ctx2d = attn_out.transpose(0, 2, 1, 3).reshape(M, H)

    # ---- output dense + residual + LayerNorm, grid over token tiles ------
    tm_ln = min(tm, M)
    out2d = pl.pallas_call(
        functools.partial(_out_dense_layernorm_kernel, eps=eps),
        out_shape=jax.ShapeDtypeStruct((M, H), hidden_states.dtype),
        grid_spec=pltpu.PrefetchScalarGridSpec(
            num_scalar_prefetch=0,
            grid=(pl.cdiv(M, tm_ln),),
            in_specs=[
                pl.BlockSpec((tm_ln, H), lambda i: (i, 0)),
                pl.BlockSpec((H, H), lambda i: (0, 0)),
                pl.BlockSpec((1, H), lambda i: (0, 0)),
                pl.BlockSpec((tm_ln, H), lambda i: (i, 0)),
                pl.BlockSpec((1, H), lambda i: (0, 0)),
                pl.BlockSpec((1, H), lambda i: (0, 0)),
            ],
            out_specs=pl.BlockSpec((tm_ln, H), lambda i: (i, 0)),
        ),
        compiler_params=pltpu.CompilerParams(
            dimension_semantics=("parallel",),
        ),
    )(ctx2d, prepared["wo_t"], prepared["bo"], x2d,
      prepared["gamma"], prepared["beta"])

    return out2d.reshape(B, S, H)


# --------------------------------------------------------------------------
# Pure-JAX reference (mirrors the PyTorch forward, eval mode).
# --------------------------------------------------------------------------
def reference_bert_attention(params, hidden_states, attention_mask, num_heads,
                             eps=1e-12):
    B, S, H = hidden_states.shape
    D = H // num_heads
    q = hidden_states @ params["wq"].T + params["bq"]
    k = hidden_states @ params["wk"].T + params["bk"]
    v = hidden_states @ params["wv"].T + params["bv"]

    def split(x):
        return x.reshape(B, S, num_heads, D).transpose(0, 2, 1, 3)

    q, k, v = split(q), split(k), split(v)
    scores = jnp.einsum("bhqd,bhkd->bhqk", q, k) / math.sqrt(D)
    scores = scores + attention_mask
    probs = jax.nn.softmax(scores, axis=-1)
    ctx = jnp.einsum("bhqk,bhkd->bhqd", probs, v)
    ctx = ctx.transpose(0, 2, 1, 3).reshape(B, S, H)
    y = ctx @ params["wo"].T + params["bo"] + hidden_states
    mean = y.mean(-1, keepdims=True)
    var = ((y - mean) ** 2).mean(-1, keepdims=True)
    normed = (y - mean) / jnp.sqrt(var + eps)
    return normed * params["gamma"] + params["beta"]


if __name__ == "__main__":
    # Small BERT-like shapes: batch=2, seq=8, hidden=32, heads=4 (head_dim=8).
    B, S, H, NH = 2, 8, 32, 4

    key = jax.random.PRNGKey(0)
    ks = jax.random.split(key, 11)
    bound = 1.0 / math.sqrt(H)

    hidden_states = jax.random.normal(ks[0], (B, S, H), dtype=jnp.float32)
    params = {
        "wq": jax.random.uniform(ks[1], (H, H), minval=-bound, maxval=bound, dtype=jnp.float32),
        "bq": jax.random.uniform(ks[2], (H,), minval=-bound, maxval=bound, dtype=jnp.float32),
        "wk": jax.random.uniform(ks[3], (H, H), minval=-bound, maxval=bound, dtype=jnp.float32),
        "bk": jax.random.uniform(ks[4], (H,), minval=-bound, maxval=bound, dtype=jnp.float32),
        "wv": jax.random.uniform(ks[5], (H, H), minval=-bound, maxval=bound, dtype=jnp.float32),
        "bv": jax.random.uniform(ks[6], (H,), minval=-bound, maxval=bound, dtype=jnp.float32),
        "wo": jax.random.uniform(ks[7], (H, H), minval=-bound, maxval=bound, dtype=jnp.float32),
        "bo": jax.random.uniform(ks[8], (H,), minval=-bound, maxval=bound, dtype=jnp.float32),
        "gamma": 1.0 + 0.1 * jax.random.normal(ks[9], (H,), dtype=jnp.float32),
        "beta": 0.1 * jax.random.normal(ks[10], (H,), dtype=jnp.float32),
    }

    # Additive attention mask [B, 1, 1, S]: mask out the last 2 keys of batch 1.
    attention_mask = jnp.zeros((B, 1, 1, S), dtype=jnp.float32)
    attention_mask = attention_mask.at[1, :, :, S - 2:].set(-10000.0)

    prepared = prepare_bert_attention_params(params)
    out = bert_attention(prepared, hidden_states, attention_mask, num_heads=NH)
    out = jax.block_until_ready(out)

    ref = reference_bert_attention(params, hidden_states, attention_mask, NH)
    assert out.shape == (B, S, H)
    assert jnp.allclose(out, ref, atol=2e-5, rtol=2e-5), \
        f"max abs err = {jnp.max(jnp.abs(out - ref))}"

    print("KERNEL_OK")
</pallas_src>

<mosaic_0001>
module attributes {stable_mosaic.version = 11 : i64} {
  func.func @_matmul_bias_kernel(%arg0: i32, %arg1: i32, %arg2: memref<16x32xf32, #tpu.memory_space<vmem>>, %arg3: memref<32x96xf32, #tpu.memory_space<vmem>>, %arg4: memref<1x96xf32, #tpu.memory_space<vmem>>, %arg5: memref<16x96xf32, #tpu.memory_space<vmem>>) attributes {dimension_semantics = [#tpu.dimension_semantics<parallel>, #tpu.dimension_semantics<parallel>], iteration_bounds = array<i64: 1, 1>, scalar_prefetch = 0 : i64, scratch_operands = 0 : i64, tpu.core_type = #tpu.core_type<tc>, window_params = [{transform_indices = @transform_0, window_bounds = array<i64: 16, 32>}, {transform_indices = @transform_1, window_bounds = array<i64: 32, 96>}, {transform_indices = @transform_2, window_bounds = array<i64: 1, 96>}, {transform_indices = @transform_3, window_bounds = array<i64: 16, 96>}]} {
    %c0 = arith.constant 0 : index
    %c0_0 = arith.constant 0 : index
    %0 = vector.load %arg2[%c0, %c0_0] : memref<16x32xf32, #tpu.memory_space<vmem>>, vector<16x32xf32>
    %c0_1 = arith.constant 0 : index
    %c0_2 = arith.constant 0 : index
    %1 = vector.load %arg3[%c0_1, %c0_2] : memref<32x96xf32, #tpu.memory_space<vmem>>, vector<32x96xf32>
    %cst = arith.constant dense<0.000000e+00> : vector<16x96xf32>
    %2 = tpu.matmul %0, %1, %cst {dimension_numbers = #tpu.dot_dimension_numbers<[1], [0], [0], [1], [0, 0, 1, 1], [], []>} : vector<16x32xf32>, vector<32x96xf32>, vector<16x96xf32> -> vector<16x96xf32>
    %c0_3 = arith.constant 0 : index
    %c0_4 = arith.constant 0 : index
    %3 = vector.load %arg4[%c0_3, %c0_4] : memref<1x96xf32, #tpu.memory_space<vmem>>, vector<1x96xf32>
    %4 = vector.broadcast %3 : vector<1x96xf32> to vector<16x96xf32>
    %5 = arith.addf %2, %4 : vector<16x96xf32>
    %c0_5 = arith.constant 0 : index
    %c0_6 = arith.constant 0 : index
    %6 = vector.load %arg5[%c0_5, %c0_6] : memref<16x96xf32, #tpu.memory_space<vmem>>, vector<16x96xf32>
    tpu.vector_store %arg5[%c0_5, %c0_6], %5 {strides = array<i32>} : memref<16x96xf32, #tpu.memory_space<vmem>>, vector<16x96xf32>,
    return
  }
  func.func @transform_0(%arg0: i32, %arg1: i32) -> (i32, i32) {
    %c0_i32 = arith.constant 0 : i32
    %c0_i32_0 = arith.constant 0 : i32
    return %arg0, %c0_i32 : i32, i32
  }
  func.func @transform_1(%arg0: i32, %arg1: i32) -> (i32, i32) {
    %c0_i32 = arith.constant 0 : i32
    %c0_i32_0 = arith.constant 0 : i32
    return %c0_i32, %arg1 : i32, i32
  }
  func.func @transform_2(%arg0: i32, %arg1: i32) -> (i32, i32) {
    %c0_i32 = arith.constant 0 : i32
    %c0_i32_0 = arith.constant 0 : i32
    return %c0_i32, %arg1 : i32, i32
  }
  func.func @transform_3(%arg0: i32, %arg1: i32) -> (i32, i32) {
    %c0_i32 = arith.constant 0 : i32
    return %arg0, %arg1 : i32, i32
  }
}

</mosaic_0001>

<bundles_post_ra>
// kernel: tpu_custom_call.1
= control target key start
LH: loop header
LB: loop body
LE: loop exit
PB: predicated region body
PF: predicated region fallthrough
CT: control target
= control target key end

     0   :  { %8 = vsyncpa [#allocation3], 0  ;;  %s337_s0 = inlined_call_operand.hbm [shape: f32[16,32], index: 0, kind: input, shape index: {}]   ;;  %s338_s1 = inlined_call_operand.hbm [shape: f32[32,96], index: 1, kind: input, shape index: {}]   ;;  %s339_s2 = inlined_call_operand.vmem [shape: f32[1,96], index: 2, kind: input, shape index: {}]   ;;  %s340_s3 = inlined_call_operand.hbm [shape: f32[16,96], index: 3, kind: output, shape index: {}]  }
   0x1   :  { %9 = vsyncpa [#allocation6], 0 }
   0x2   :  { %10 = vsyncpa [#allocation4], 0  ;;  %s264_s12 = smov [#allocation2]   ;;  %s192_s16 = scalar_lea.hbm %s337_s0, 256 }
   0x3   :  { %s16_s13 = sshll.u32 %s264_s12, 4  ;;  %p193_p0 = scmp.ne.s32.totalorder %s337_s0, %s192_s16  ;;  %s17_s13 = int_to_ptr.vmem [resolvable:$true] %s16_s13 }
   0x4   :  { %p196_p1 = scmp.lt.u32.totalorder %s192_s16, %s337_s0 }
   0x6   :  { %p198_p2 = pnand %p196_p1, %p193_p0 }
   0x8   :  { %201 = shalt.err (!%p198_p2)
}
   0x9   :  { %s202_s21 = scalar_lea.vmem %s17_s13, 256  ;;  %p207_p4 = scmp.lt.s32.totalorder %s17_s13, %s17_s13 }
   0xa   :  { %p203_p3 = scmp.ne.s32.totalorder %s17_s13, %s202_s21  ;;  %p208_p5 = scmp.lt.s32.totalorder %s202_s21, %s202_s21 }
   0xc   :  { %p209_p6 = por %p208_p5, %p207_p4 }
   0xe   :  { %p210_p7 = pnand %p209_p6, %p203_p3 }
  0x10   :  { %213 = shalt.err (!%p210_p7)
}
  0x11   :  { %s265_s22 = smov 128   ;;  %s266_s23 = smov 8  }
  0x12   :  { %22 = dma.hbm_to_vmem [thread:$0]  %s337_s0, 256, %s17_s13, [#allocation3], %s265_s22, %s265_s22, %s266_s23  }
  0x13   :  { %s267_s26 = smov [#allocation5]   ;;  %s214_s30 = scalar_lea.hbm %s338_s1, 512 }
  0x14   :  { %s28_s27 = sshll.u32 %s267_s26, 4  ;;  %p215_p8 = scmp.ne.s32.totalorder %s338_s1, %s214_s30  ;;  %s29_s27 = int_to_ptr.vmem [resolvable:$true] %s28_s27 }
  0x15   :  { %p218_p9 = scmp.lt.u32.totalorder %s214_s30, %s338_s1 }
  0x17   :  { %p220_p10 = pnand %p218_p9, %p215_p8 }
  0x19   :  { %223 = shalt.err (!%p220_p10)
}
  0x1a   :  { %s224_s8 = scalar_lea.vmem %s29_s27, 512  ;;  %p229_p12 = scmp.lt.s32.totalorder %s29_s27, %s29_s27 }
  0x1b   :  { %p225_p11 = scmp.ne.s32.totalorder %s29_s27, %s224_s8  ;;  %p230_p13 = scmp.lt.s32.totalorder %s224_s8, %s224_s8 }
  0x1d   :  { %p231_p0 = por %p230_p13, %p229_p12 }
  0x1f   :  { %p232_p1 = pnand %p231_p0, %p225_p11 }
  0x21   :  { %235 = shalt.err (!%p232_p1)
}
  0x22   :  { %34 = dma.hbm_to_vmem [thread:$0]  %s338_s1, 512, %s29_s27, [#allocation6], %s265_s22, %s265_s22, %s266_s23  }
  0x23   :  { %258 = dma.done.wait [#allocation3], 256  }
  0x24   :  { %259 = vsyncadd [#allocation3], 4294967040 }
  0x25   :  { %260 = dma.done.wait [#allocation6], 512  }
  0x26   :  { %261 = vsyncadd [#allocation6], 4294966784  ;;  %vm56_vm0 = vcmask 261120   ;;  %v45_v0 = vld [vmem:[#allocation5] sm:$0xff]  ;;  %v46_v1 = vld [vmem:[#allocation5 + $0x8] sm:$0xff]  ;;  %s268_s11 = smov [#allocation7]  }
  0x27   :  { %v47_v2 = vld [vmem:[#allocation5 + $0x10] sm:$0xff]  ;;  %v179_v3 = vpack.c.bf16 %v46_v1, %v45_v0  ;;  %v48_v4 = vld [vmem:[#allocation5 + $0x18] sm:$0xff]  ;;  %s146_s12 = sshll.u32 %s268_s11, 4  ;;  %vm138_vm1 = vcmask 785408   ;;  %s147_s12 = int_to_ptr.vmem [resolvable:$true] %s146_s12 }
  0x28   :  { %v43_v5 = vld [vmem:[#allocation2] sm:$0xff]  ;;  %v183_v6 = vpack.c.bf16 %v48_v4, %v47_v2  ;;  %v44_v7 = vld [vmem:[#allocation2 + $0x8] sm:$0xff]  ;;  %s236_s13 = scalar_lea.vmem %s147_s12, 256  ;;  %p241_p3 = scmp.lt.s32.totalorder %s147_s12, %s147_s12 }
  0x29   :  { %176 = vmatprep.mubr.msk.f32.mxu0 %vm56_vm0, %v43_v5  ;;  %180 = vmatprep.subr.bf16.mxu0 %v179_v3  ;;  %v159_v8 = vld [vmem:[%s339_s2] ss:$0 sm:$0xff]  ;;  %p237_p2 = scmp.ne.s32.totalorder %s147_s12, %s236_s13  ;;  %p242_p4 = scmp.lt.s32.totalorder %s236_s13, %s236_s13 }
  0x2a   :  { %182 = vmatpush3.bf16.msra.mxu0 %v179_v3 }
  0x2b   :  { %184 = vmatprep.subr.bf16.mxu0 %v183_v6  ;;  %p243_p5 = por %p242_p4, %p241_p3 }
  0x2d   :  { %p244_p6 = pnand %p243_p5, %p237_p2 }
  0x2e   :  { %186 = vmatpush3.bf16.msra.mxu0 %v183_v6 }
  0x31   :  { %177 = vmatmul.mubr.msk.f32.vlgmr.msra.gmra.mrb[0].mxu0 %vm56_vm0, %v44_v7 }
 0x104   :  { %v178_v9 = vpop.f32.mrb[0].mxu0 }
 0x105   :  { %v135_v10 = vadd.f32 %v178_v9, %v159_v8  ;;  %v129_v11 = vpop.f32.mrb[1].mxu0 }
 0x106   :  { %v130_v12 = vadd.f32 %v159_v8, %v129_v11 }
 0x107   :  { %140 = vst.msk [vmem:[#allocation7 + $0x8] sm:$0xff] %vm138_vm1, %v135_v10 }
 0x108   :  { %139 = vst.msk [vmem:[#allocation7] sm:$0xff] %vm138_vm1, %v130_v12 }
 0x109   :  { %247 = shalt.err (!%p244_p6)
}
 0x10a   :  { %s248_s2 = scalar_lea.hbm %s340_s3, 256 }
 0x10b   :  { %p249_p7 = scmp.ne.s32.totalorder %s340_s3, %s248_s2  ;;  %p252_p8 = scmp.lt.u32.totalorder %s248_s2, %s340_s3 }
 0x10d   :  { %p254_p9 = pnand %p252_p8, %p249_p7 }
 0x10f   :  { %257 = shalt.err (!%p254_p9)
}
 0x110   :  { %152 = dma.vmem_to_hbm [thread:$0]  %s147_s12, 256, %s340_s3, [#allocation4], %s265_s22, %s265_s22, %s266_s23  }
 0x111   :  { %262 = dma.done.wait [#allocation4], 256  }
 0x112   :  { %263 = vsyncadd [#allocation4], 4294967040 }
 0x113   :  { %156 = vsyncpa [#allocation3], 1 }
 0x114   :  { %157 = vsyncpa [#allocation6], 1 }
 0x115   :  { %158 = vsyncpa [#allocation4], 1 }

</bundles_post_ra>
